<compile_context>
chip_gen: v7x
topology: tpu7x:2x2x1
jax: 0.10.0
libtpu: 0.0.40
codegen_flags: <defaults>
</compile_context>

<pallas_src>
import functools

import jax
import jax.numpy as jnp
from jax.experimental import pallas as pl
from jax.experimental.pallas import tpu as pltpu

TIME_WINDOW = 3
THRESH = 0.5          # BatchNorm3d1 affine weight init
BN_EPS = 1e-5


def autopad(k, p=None):
    if p is None:
        p = k // 2 if isinstance(k, int) else [x // 2 for x in k]
    return p


# ----------------------------- Pallas kernel --------------------------------

def _fused_conv_bn_kernel(patch_ref, w_ref, out_ref, *, n_samples, p_per_sample,
                          eps, gamma):
    # patch_ref: (KKCp, N*P)   bf16 im2col slab, contraction order (ci, kh, kw),
    #                          zero-padded along KKC; lane dim = N*P (lane-dense).
    # w_ref:     (Cout, KKCp)  bf16 flattened conv weight (same order + padding)
    # out_ref:   (N, Cout, P)  f32 normalized conv output
    # One matmul for all time steps / batch elements: (Cout, KKCp)@(KKCp, N*P),
    # f32 accumulation on the MXU.
    acc = jnp.dot(w_ref[...], patch_ref[...],
                  preferred_element_type=jnp.float32)              # (Cout, N*P)

    # BatchNorm3d batch statistics per channel over (T*B*Ho*Wo), biased var,
    # two-pass formulation for numerical stability.  (KKC zero-padding does not
    # touch the lane axis, so the count is exact.)
    inv_count = 1.0 / float(n_samples * p_per_sample)
    mean = jnp.sum(acc, axis=-1, keepdims=True) * inv_count        # (Cout, 1)
    cent = acc - mean
    var = jnp.sum(cent * cent, axis=-1, keepdims=True) * inv_count
    scale = jax.lax.rsqrt(var + eps) * gamma                       # (Cout, 1)
    y = cent * scale                                               # (Cout, N*P)

    # Per-sample lane slices; P is a multiple of 128 -> unmasked full-tile stores.
    for i in range(n_samples):
        out_ref[i] = y[:, i * p_per_sample:(i + 1) * p_per_sample]


# ------------------------------- wrapper -------------------------------------

def conv1_forward(x, weight, k, s, p=None, g=1):
    """Conv_1.forward: bn(conv(x)).  x: (T, B, Cin, H, W) f32."""
    assert g == 1  # TODO(synk): grouped convolution (g > 1) not implemented
    p = autopad(k, p)
    T, B, Cin, H, W = x.shape
    Cout = weight.shape[0]
    K = k
    Ho = (H - K + 2 * p) // s + 1
    Wo = (W - K + 2 * p) // s + 1
    N, P = T * B, Ho * Wo
    KKC = Cin * K * K
    KKCP = ((KKC + 15) // 16) * 16        # pad contraction to bf16 sublane pack

    # --- glue: cast to bf16 FIRST, then pad + im2col slab (KKCp, N*P) --------
    # contraction index order is (ci, kh, kw), matching weight.reshape(Cout, -1)
    xf = x.astype(jnp.bfloat16).reshape(N, Cin, H, W)
    xp = jnp.pad(xf, ((0, 0), (0, 0), (p, p), (p, p)))
    cols = [xp[:, :, kh:kh + s * (Ho - 1) + 1:s, kw:kw + s * (Wo - 1) + 1:s]
            for kh in range(K) for kw in range(K)]               # each (N, Cin, Ho, Wo)
    patches = jnp.stack(cols, axis=2).reshape(N, KKC, P)         # (N, Cin*K*K, Ho*Wo)
    patches = jnp.transpose(patches, (1, 0, 2)).reshape(KKC, N * P)
    patches = jnp.pad(patches, ((0, KKCP - KKC), (0, 0)))        # (KKCp, N*P) bf16

    w_flat = weight.reshape(Cout, KKC).astype(jnp.bfloat16)      # OIHW flatten
    w_flat = jnp.pad(w_flat, ((0, 0), (0, KKCP - KKC)))          # (Cout, KKCp)

    kernel = functools.partial(_fused_conv_bn_kernel,
                               n_samples=N, p_per_sample=P,
                               eps=BN_EPS, gamma=THRESH)

    # Single fused call: inputs (~145 KB bf16) + output (~48 KB f32) fit in VMEM.
    # NOTE: Cout=8 / KKC=36 barely touches the MXU; the kernel is overhead/DMA
    # bound at this size, so no further matmul tuning is warranted.
    y = pl.pallas_call(
        kernel,
        out_shape=jax.ShapeDtypeStruct((N, Cout, P), jnp.float32),
        grid=(1,),
        in_specs=[pl.BlockSpec((KKCP, N * P), lambda i: (0, 0)),
                  pl.BlockSpec((Cout, KKCP), lambda i: (0, 0))],
        out_specs=pl.BlockSpec((N, Cout, P), lambda i: (0, 0, 0)),
        compiler_params=pltpu.CompilerParams(
            dimension_semantics=("arbitrary",)),
    )(patches, w_flat)

    # (N, Cout, P) -> (T, B, Cout, Ho, Wo): pure reshape, no transpose needed.
    return y.reshape(T, B, Cout, Ho, Wo)


# ------------------------------ reference ------------------------------------

def ref_forward(x, weight, k, s, p=None):
    p = autopad(k, p)
    T, B, Cin, H, W = x.shape
    xf = x.reshape(T * B, Cin, H, W)
    y = jax.lax.conv_general_dilated(
        xf, weight, (s, s), [(p, p), (p, p)],
        dimension_numbers=("NCHW", "OIHW", "NCHW"),
        precision=jax.lax.Precision.HIGHEST)
    mean = y.mean(axis=(0, 2, 3), keepdims=True)
    var = jnp.mean((y - mean) ** 2, axis=(0, 2, 3), keepdims=True)
    yn = (y - mean) / jnp.sqrt(var + BN_EPS) * THRESH
    return yn.reshape(T, B, *y.shape[1:])


if __name__ == "__main__":
    key = jax.random.PRNGKey(0)
    kx, kw = jax.random.split(key)

    T, B, Cin, Cout, H, W, k, s = TIME_WINDOW, 2, 4, 8, 16, 16, 3, 1
    x = jax.random.normal(kx, (T, B, Cin, H, W), dtype=jnp.float32)
    weight = jax.random.normal(kw, (Cout, Cin, k, k), dtype=jnp.float32) / jnp.sqrt(
        float(Cin * k * k))

    out = jax.block_until_ready(conv1_forward(x, weight, k, s))
    assert out.shape == (T, B, Cout, H, W)

    ref = ref_forward(x, weight, k, s)
    max_err = float(jnp.max(jnp.abs(out - ref)))
    # bf16 inputs / im2col + bf16 MXU operands (f32 accumulation) vs f32 HIGHEST reference.
    assert jnp.allclose(out, ref, rtol=2e-2, atol=2e-2), f"max_err={max_err}"

    print("KERNEL_OK")
</pallas_src>

<mosaic_0001>
module attributes {stable_mosaic.version = 11 : i64} {
  func.func @_fused_conv_bn_kernel(%arg0: i32, %arg1: memref<48x1536xbf16, #tpu.memory_space<vmem>>, %arg2: memref<8x48xbf16, #tpu.memory_space<vmem>>, %arg3: memref<6x8x256xf32, #tpu.memory_space<vmem>>) attributes {dimension_semantics = [#tpu.dimension_semantics<arbitrary>], iteration_bounds = array<i64: 1>, scalar_prefetch = 0 : i64, scratch_operands = 0 : i64, tpu.core_type = #tpu.core_type<tc>, window_params = [{pipeline_mode = #tpu.pipeline_mode<synchronous>, transform_indices = @transform_0, window_bounds = array<i64: 48, 1536>}, {pipeline_mode = #tpu.pipeline_mode<synchronous>, transform_indices = @transform_1, window_bounds = array<i64: 8, 48>}, {pipeline_mode = #tpu.pipeline_mode<synchronous>, transform_indices = @transform_2, window_bounds = array<i64: 6, 8, 256>}]} {
    %c0 = arith.constant 0 : index
    %c0_0 = arith.constant 0 : index
    %0 = vector.load %arg2[%c0, %c0_0] : memref<8x48xbf16, #tpu.memory_space<vmem>>, vector<8x48xbf16>
    %c0_1 = arith.constant 0 : index
    %c0_2 = arith.constant 0 : index
    %1 = vector.load %arg1[%c0_1, %c0_2] : memref<48x1536xbf16, #tpu.memory_space<vmem>>, vector<48x1536xbf16>
    %cst = arith.constant dense<0.000000e+00> : vector<8x1536xf32>
    %2 = tpu.matmul %0, %1, %cst {dimension_numbers = #tpu.dot_dimension_numbers<[1], [0], [0], [1], [0, 0, 1, 1], [], []>} : vector<8x48xbf16>, vector<48x1536xbf16>, vector<8x1536xf32> -> vector<8x1536xf32>
    %cst_3 = arith.constant dense<0.000000e+00> : vector<8xf32>
    %3 = vector.multi_reduction <add>, %2, %cst_3 [1] : vector<8x1536xf32> to vector<8xf32>
    %4 = vector.shape_cast %3 : vector<8xf32> to vector<8x1xf32>
    %cst_4 = arith.constant 6.51041686E-4 : f32
    %5 = vector.broadcast %cst_4 : f32 to vector<8x1xf32>
    %6 = arith.mulf %4, %5 : vector<8x1xf32>
    %7 = vector.broadcast %6 : vector<8x1xf32> to vector<8x1536xf32>
    %8 = arith.subf %2, %7 : vector<8x1536xf32>
    %9 = arith.mulf %8, %8 : vector<8x1536xf32>
    %cst_5 = arith.constant dense<0.000000e+00> : vector<8xf32>
    %10 = vector.multi_reduction <add>, %9, %cst_5 [1] : vector<8x1536xf32> to vector<8xf32>
    %11 = vector.shape_cast %10 : vector<8xf32> to vector<8x1xf32>
    %cst_6 = arith.constant 6.51041686E-4 : f32
    %12 = vector.broadcast %cst_6 : f32 to vector<8x1xf32>
    %13 = arith.mulf %11, %12 : vector<8x1xf32>
    %cst_7 = arith.constant 9.99999974E-6 : f32
    %14 = vector.broadcast %cst_7 : f32 to vector<8x1xf32>
    %15 = arith.addf %13, %14 : vector<8x1xf32>
    %16 = math.rsqrt %15 : vector<8x1xf32>
    %cst_8 = arith.constant 5.000000e-01 : f32
    %17 = vector.broadcast %cst_8 : f32 to vector<8x1xf32>
    %18 = arith.mulf %16, %17 : vector<8x1xf32>
    %19 = vector.broadcast %18 : vector<8x1xf32> to vector<8x1536xf32>
    %20 = arith.mulf %8, %19 : vector<8x1536xf32>
    %21 = vector.extract_strided_slice %20 {offsets = [0, 0], sizes = [8, 256], strides = [1, 1]} : vector<8x1536xf32> to vector<8x256xf32>
    %c0_9 = arith.constant 0 : index
    %c0_10 = arith.constant 0 : index
    %c0_11 = arith.constant 0 : index
    %22 = vector.load %arg3[%c0_9, %c0_10, %c0_11] : memref<6x8x256xf32, #tpu.memory_space<vmem>>, vector<1x8x256xf32>
    %23 = vector.shape_cast %22 : vector<1x8x256xf32> to vector<8x256xf32>
    %24 = vector.shape_cast %21 : vector<8x256xf32> to vector<1x8x256xf32>
    tpu.vector_store %arg3[%c0_9, %c0_10, %c0_11], %24 {strides = array<i32>} : memref<6x8x256xf32, #tpu.memory_space<vmem>>, vector<1x8x256xf32>,
    %25 = vector.extract_strided_slice %20 {offsets = [0, 256], sizes = [8, 256], strides = [1, 1]} : vector<8x1536xf32> to vector<8x256xf32>
    %c1 = arith.constant 1 : index
    %c0_12 = arith.constant 0 : index
    %c0_13 = arith.constant 0 : index
    %26 = vector.load %arg3[%c1, %c0_12, %c0_13] : memref<6x8x256xf32, #tpu.memory_space<vmem>>, vector<1x8x256xf32>
    %27 = vector.shape_cast %26 : vector<1x8x256xf32> to vector<8x256xf32>
    %28 = vector.shape_cast %25 : vector<8x256xf32> to vector<1x8x256xf32>
    tpu.vector_store %arg3[%c1, %c0_12, %c0_13], %28 {strides = array<i32>} : memref<6x8x256xf32, #tpu.memory_space<vmem>>, vector<1x8x256xf32>,
    %29 = vector.extract_strided_slice %20 {offsets = [0, 512], sizes = [8, 256], strides = [1, 1]} : vector<8x1536xf32> to vector<8x256xf32>
    %c2 = arith.constant 2 : index
    %c0_14 = arith.constant 0 : index
    %c0_15 = arith.constant 0 : index
    %30 = vector.load %arg3[%c2, %c0_14, %c0_15] : memref<6x8x256xf32, #tpu.memory_space<vmem>>, vector<1x8x256xf32>
    %31 = vector.shape_cast %30 : vector<1x8x256xf32> to vector<8x256xf32>
    %32 = vector.shape_cast %29 : vector<8x256xf32> to vector<1x8x256xf32>
    tpu.vector_store %arg3[%c2, %c0_14, %c0_15], %32 {strides = array<i32>} : memref<6x8x256xf32, #tpu.memory_space<vmem>>, vector<1x8x256xf32>,
    %33 = vector.extract_strided_slice %20 {offsets = [0, 768], sizes = [8, 256], strides = [1, 1]} : vector<8x1536xf32> to vector<8x256xf32>
    %c3 = arith.constant 3 : index
    %c0_16 = arith.constant 0 : index
    %c0_17 = arith.constant 0 : index
    %34 = vector.load %arg3[%c3, %c0_16, %c0_17] : memref<6x8x256xf32, #tpu.memory_space<vmem>>, vector<1x8x256xf32>
    %35 = vector.shape_cast %34 : vector<1x8x256xf32> to vector<8x256xf32>
    %36 = vector.shape_cast %33 : vector<8x256xf32> to vector<1x8x256xf32>
    tpu.vector_store %arg3[%c3, %c0_16, %c0_17], %36 {strides = array<i32>} : memref<6x8x256xf32, #tpu.memory_space<vmem>>, vector<1x8x256xf32>,
    %37 = vector.extract_strided_slice %20 {offsets = [0, 1024], sizes = [8, 256], strides = [1, 1]} : vector<8x1536xf32> to vector<8x256xf32>
    %c4 = arith.constant 4 : index
    %c0_18 = arith.constant 0 : index
    %c0_19 = arith.constant 0 : index
    %38 = vector.load %arg3[%c4, %c0_18, %c0_19] : memref<6x8x256xf32, #tpu.memory_space<vmem>>, vector<1x8x256xf32>
    %39 = vector.shape_cast %38 : vector<1x8x256xf32> to vector<8x256xf32>
    %40 = vector.shape_cast %37 : vector<8x256xf32> to vector<1x8x256xf32>
    tpu.vector_store %arg3[%c4, %c0_18, %c0_19], %40 {strides = array<i32>} : memref<6x8x256xf32, #tpu.memory_space<vmem>>, vector<1x8x256xf32>,
    %41 = vector.extract_strided_slice %20 {offsets = [0, 1280], sizes = [8, 256], strides = [1, 1]} : vector<8x1536xf32> to vector<8x256xf32>
    %c5 = arith.constant 5 : index
    %c0_20 = arith.constant 0 : index
    %c0_21 = arith.constant 0 : index
    %42 = vector.load %arg3[%c5, %c0_20, %c0_21] : memref<6x8x256xf32, #tpu.memory_space<vmem>>, vector<1x8x256xf32>
    %43 = vector.shape_cast %42 : vector<1x8x256xf32> to vector<8x256xf32>
    %44 = vector.shape_cast %41 : vector<8x256xf32> to vector<1x8x256xf32>
    tpu.vector_store %arg3[%c5, %c0_20, %c0_21], %44 {strides = array<i32>} : memref<6x8x256xf32, #tpu.memory_space<vmem>>, vector<1x8x256xf32>,
    return
  }
  func.func @transform_0(%arg0: i32) -> (i32, i32) {
    %c0_i32 = arith.constant 0 : i32
    %c0_i32_0 = arith.constant 0 : i32
    %c0_i32_1 = arith.constant 0 : i32
    return %c0_i32, %c0_i32_0 : i32, i32
  }
  func.func @transform_1(%arg0: i32) -> (i32, i32) {
    %c0_i32 = arith.constant 0 : i32
    %c0_i32_0 = arith.constant 0 : i32
    %c0_i32_1 = arith.constant 0 : i32
    return %c0_i32, %c0_i32_0 : i32, i32
  }
  func.func @transform_2(%arg0: i32) -> (i32, i32, i32) {
    %c0_i32 = arith.constant 0 : i32
    %c0_i32_0 = arith.constant 0 : i32
    %c0_i32_1 = arith.constant 0 : i32
    %c0_i32_2 = arith.constant 0 : i32
    return %c0_i32, %c0_i32_0, %c0_i32_1 : i32, i32, i32
  }
}

</mosaic_0001>

<bundles_post_ra>
// kernel: tpu_custom_call.1
= control target key start
LH: loop header
LB: loop body
LE: loop exit
PB: predicated region body
PF: predicated region fallthrough
CT: control target
= control target key end

     0   :  { %7 = vsyncpa [#allocation3], 0  ;;  %s864_s0 = inlined_call_operand.hbm [shape: bf16[48,1536], index: 0, kind: input, shape index: {}]   ;;  %s865_s1 = inlined_call_operand.hbm [shape: bf16[8,48], index: 1, kind: input, shape index: {}]   ;;  %s866_s2 = inlined_call_operand.hbm [shape: f32[6,8,256], index: 2, kind: output, shape index: {}]  }
   0x1   :  { %8 = vsyncpa [#allocation6], 0 }
   0x2   :  { %9 = vsyncpa [#allocation4], 0  ;;  %s786_s9 = smov [#allocation2]   ;;  %s714_s13 = scalar_lea.hbm %s864_s0, 4608 }
   0x3   :  { %s15_s10 = sshll.u32 %s786_s9, 4  ;;  %p715_p0 = scmp.ne.s32.totalorder %s864_s0, %s714_s13  ;;  %s16_s10 = int_to_ptr.vmem [resolvable:$true] %s15_s10 }
   0x4   :  { %p718_p1 = scmp.lt.u32.totalorder %s714_s13, %s864_s0 }
   0x6   :  { %p720_p2 = pnand %p718_p1, %p715_p0 }
   0x8   :  { %723 = shalt.err (!%p720_p2)
}
   0x9   :  { %s724_s18 = scalar_lea.vmem %s16_s10, 4608  ;;  %p729_p4 = scmp.lt.s32.totalorder %s16_s10, %s16_s10 }
   0xa   :  { %p725_p3 = scmp.ne.s32.totalorder %s16_s10, %s724_s18  ;;  %p730_p5 = scmp.lt.s32.totalorder %s724_s18, %s724_s18 }
   0xc   :  { %p731_p6 = por %p730_p5, %p729_p4 }
   0xe   :  { %p732_p7 = pnand %p731_p6, %p725_p3 }
  0x10   :  { %735 = shalt.err (!%p732_p7)
}
  0x11   :  { %s787_s19 = smov 768   ;;  %s788_s20 = smov 48  }
  0x12   :  { %21 = dma.hbm_to_vmem [thread:$0]  %s864_s0, 4608, %s16_s10, [#allocation3], %s787_s19, %s787_s19, %s788_s20  }
  0x13   :  { %s789_s23 = smov [#allocation5]   ;;  %s736_s27 = scalar_lea.hbm %s865_s1, 64 }
  0x14   :  { %s28_s24 = sshll.u32 %s789_s23, 4  ;;  %p737_p8 = scmp.ne.s32.totalorder %s865_s1, %s736_s27  ;;  %s29_s24 = int_to_ptr.vmem [resolvable:$true] %s28_s24 }
  0x15   :  { %p740_p9 = scmp.lt.u32.totalorder %s736_s27, %s865_s1 }
  0x17   :  { %p742_p10 = pnand %p740_p9, %p737_p8 }
  0x19   :  { %745 = shalt.err (!%p742_p10)
}
  0x1a   :  { %s746_s4 = scalar_lea.vmem %s29_s24, 64  ;;  %p751_p12 = scmp.lt.s32.totalorder %s29_s24, %s29_s24 }
  0x1b   :  { %p747_p11 = scmp.ne.s32.totalorder %s29_s24, %s746_s4  ;;  %p752_p13 = scmp.lt.s32.totalorder %s746_s4, %s746_s4 }
  0x1d   :  { %p753_p0 = por %p752_p13, %p751_p12 }
  0x1f   :  { %p754_p1 = pnand %p753_p0, %p747_p11 }
  0x21   :  { %757 = shalt.err (!%p754_p1)
}
  0x22   :  { %31 = dma.hbm_to_vmem [thread:$0]  %s865_s1, 64, %s29_s24, [#allocation6]  }
  0x23   :  { %780 = dma.done.wait [#allocation3], 4608  }
  0x24   :  { %781 = vsyncadd [#allocation3], 4294962688 }
  0x25   :  { %782 = dma.done.wait [#allocation6], 64  }
  0x26   :  { %783 = vsyncadd [#allocation6], 4294967232  ;;  %v790_v0 = vmov 0   ;;  %v658_v1 = vld [vmem:[#allocation2 + $0x4] ss:$48 sps:$4 sm:$0xff]   ;;  %vm256_vm0 = vcmask 392192  }
  0x27   :  { %292 = vmatprep.mubr.bf16.mxu0 %v790_v0  ;;  %333 = vmatprep.mubr.bf16.mxu1 %v790_v0  ;;  %v660_v2 = vld [vmem:[#allocation2] ss:$48 sps:$4 sm:$0xff]   ;;  %v661_v3 = vld [vmem:[#allocation2 + $0xc] ss:$48 sps:$4 sm:$0xff]   ;;  %v663_v4 = vld [vmem:[#allocation2 + $0x8] ss:$48 sps:$4 sm:$0xff]  }
  0x28   :  { %260 = vmatprep.subr.bf16.mxu0 %v658_v1  ;;  %v664_v5 = vld [vmem:[#allocation2 + $0x64] ss:$48 sps:$4 sm:$0xff]   ;;  %v666_v6 = vld [vmem:[#allocation2 + $0x60] ss:$48 sps:$4 sm:$0xff]   ;;  %301 = vmatprep.subr.bf16.mxu1 %v661_v3  ;;  %v667_v7 = vld [vmem:[#allocation2 + $0x6c] ss:$48 sps:$4 sm:$0xff]  }
  0x29   :  { %261 = vmatpush1.bf16.msra.mxu0 %v660_v2  ;;  %302 = vmatpush1.bf16.msra.mxu1 %v663_v4  ;;  %v669_v8 = vld [vmem:[#allocation2 + $0x68] ss:$48 sps:$4 sm:$0xff]   ;;  %v670_v9 = vld [vmem:[#allocation2 + $0xc4] ss:$48 sps:$4 sm:$0xff]   ;;  %v672_v10 = vld [vmem:[#allocation2 + $0xc0] ss:$48 sps:$4 sm:$0xff]  }
  0x2a   :  { %262 = vmatprep.subr.bf16.mxu0 %v664_v5  ;;  %303 = vmatprep.subr.bf16.mxu1 %v667_v7  ;;  %v673_v11 = vld [vmem:[#allocation2 + $0xcc] ss:$48 sps:$4 sm:$0xff]   ;;  %v675_v12 = vld [vmem:[#allocation2 + $0xc8] ss:$48 sps:$4 sm:$0xff]   ;;  %v678_v13 = vld [vmem:[#allocation2 + $0x14] ss:$48 sps:$4 sm:$0xff]  }
  0x2b   :  { %v39_v14 = vld [vmem:[#allocation5] sm:$0xf]  ;;  %v681_v15 = vld [vmem:[#allocation2 + $0x1c] ss:$48 sps:$4 sm:$0xff]   ;;  %v684_v17 = vld [vmem:[#allocation2 + $0x74] ss:$48 sps:$4 sm:$0xff]  }
  0x2c   :  { %v676_v16 = vld [vmem:[#allocation2 + $0x10] ss:$48 sps:$4 sm:$0xff]   ;;  %v679_v18 = vld [vmem:[#allocation2 + $0x18] ss:$48 sps:$4 sm:$0xff]   ;;  %v687_v19 = vld [vmem:[#allocation2 + $0x7c] ss:$48 sps:$4 sm:$0xff]  }
  0x2d   :  { %263 = vmatpush1.bf16.msra.mxu0 %v666_v6  ;;  %304 = vmatpush1.bf16.msra.mxu1 %v669_v8  ;;  %v682_v20 = vld [vmem:[#allocation2 + $0x70] ss:$48 sps:$4 sm:$0xff]   ;;  %v690_v21 = vld [vmem:[#allocation2 + $0xd4] ss:$48 sps:$4 sm:$0xff]   ;;  %v685_v22 = vld [vmem:[#allocation2 + $0x78] ss:$48 sps:$4 sm:$0xff]  }
  0x2e   :  { %264 = vmatprep.subr.bf16.mxu0 %v670_v9  ;;  %305 = vmatprep.subr.bf16.mxu1 %v673_v11  ;;  %v693_v23 = vld [vmem:[#allocation2 + $0xdc] ss:$48 sps:$4 sm:$0xff]   ;;  %v688_v24 = vld [vmem:[#allocation2 + $0xd0] ss:$48 sps:$4 sm:$0xff]   ;;  %v696_v25 = vld [vmem:[#allocation2 + $0x24] ss:$48 sps:$4 sm:$0xff]  }
  0x2f   :  { %v691_v26 = vld [vmem:[#allocation2 + $0xd8] ss:$48 sps:$4 sm:$0xff]   ;;  %v699_v27 = vld [vmem:[#allocation2 + $0x2c] ss:$48 sps:$4 sm:$0xff]   ;;  %v694_v28 = vld [vmem:[#allocation2 + $0x20] ss:$48 sps:$4 sm:$0xff]  }
  0x30   :  { %v702_v29 = vld [vmem:[#allocation2 + $0x84] ss:$48 sps:$4 sm:$0xff]   ;;  %v697_v30 = vld [vmem:[#allocation2 + $0x28] ss:$48 sps:$4 sm:$0xff]   ;;  %v705_v31 = vld [vmem:[#allocation2 + $0x8c] ss:$48 sps:$4 sm:$0xff]  }
  0x31   :  { %265 = vmatpush1.bf16.msra.mxu0 %v672_v10  ;;  %306 = vmatpush1.bf16.msra.mxu1 %v675_v12  ;;  %v700_v32 = vld [vmem:[#allocation2 + $0x80] ss:$48 sps:$4 sm:$0xff]   ;;  %v708_v33 = vld [vmem:[#allocation2 + $0xe4] ss:$48 sps:$4 sm:$0xff]   ;;  %v703_v34 = vld [vmem:[#allocation2 + $0x88] ss:$48 sps:$4 sm:$0xff]  }
  0x32   :  { %342 = vmatprep.subr.bf16.mxu0 %v678_v13  ;;  %383 = vmatprep.subr.bf16.mxu1 %v681_v15  ;;  %v711_v35 = vld [vmem:[#allocation2 + $0xec] ss:$48 sps:$4 sm:$0xff]   ;;  %v706_v36 = vld [vmem:[#allocation2 + $0xe0] ss:$48 sps:$4 sm:$0xff]   ;;  %v709_v37 = vld [vmem:[#allocation2 + $0xe8] ss:$48 sps:$4 sm:$0xff]  }
  0x33   :  { %s791_s1 = smov [#allocation7]  }
  0x34   :  { %644 = vmatmul.mubr.msk.bf16.vlgmr.msra.gmra.mrb[0].mxu0 %vm256_vm0, %v39_v14  ;;  %645 = vmatmul.mubr.msk.bf16.vlgmr.msra.gmra.mrb[0].mxu1 %vm256_vm0, %v39_v14  ;;  %s595_s6 = sshll.u32 %s791_s1, 4  ;;  %s845_s6 = int_to_ptr.vmem [resolvable:$true] %s595_s6 }
  0x35   :  { %343 = vmatpush1.bf16.msra.mxu0 %v676_v16  ;;  %374 = vmatprep.mubr.bf16.mxu0 %v790_v0  ;;  %s758_s7 = scalar_lea.vmem %s845_s6, 1536  ;;  %p763_p3 = scmp.lt.s32.totalorder %s845_s6, %s845_s6 }
  0x36   :  { %344 = vmatprep.subr.bf16.mxu0 %v684_v17  ;;  %384 = vmatpush1.bf16.msra.mxu1 %v679_v18  ;;  %p759_p2 = scmp.ne.s32.totalorder %s845_s6, %s758_s7  ;;  %p764_p4 = scmp.lt.s32.totalorder %s758_s7, %s758_s7 }
  0x37   :  { %415 = vmatprep.mubr.bf16.mxu1 %v790_v0  ;;  %385 = vmatprep.subr.bf16.mxu1 %v687_v19 }
  0x38   :  { %p765_p5 = por %p764_p4, %p763_p3 }
  0x39   :  { %345 = vmatpush1.bf16.msra.mxu0 %v682_v20 }
  0x3a   :  { %346 = vmatprep.subr.bf16.mxu0 %v690_v21  ;;  %386 = vmatpush1.bf16.msra.mxu1 %v685_v22  ;;  %p766_p6 = pnand %p765_p5, %p759_p2 }
  0x3b   :  { %387 = vmatprep.subr.bf16.mxu1 %v693_v23 }
  0x3d   :  { %347 = vmatpush1.bf16.msra.mxu0 %v688_v24 }
  0x3e   :  { %424 = vmatprep.subr.bf16.mxu0 %v696_v25  ;;  %388 = vmatpush1.bf16.msra.mxu1 %v691_v26 }
  0x3f   :  { %465 = vmatprep.subr.bf16.mxu1 %v699_v27 }
  0x40   :  { %646 = vmatmul.mubr.msk.bf16.vlgmr.msra.gmra.mrb[4].mxu0 %vm256_vm0, %v39_v14 }
  0x41   :  { %425 = vmatpush1.bf16.msra.mxu0 %v694_v28  ;;  %456 = vmatprep.mubr.bf16.mxu0 %v790_v0 }
  0x42   :  { %647 = vmatmul.mubr.msk.bf16.vlgmr.msra.gmra.mrb[4].mxu1 %vm256_vm0, %v39_v14  ;;  %426 = vmatprep.subr.bf16.mxu0 %v702_v29 }
  0x43   :  { %466 = vmatpush1.bf16.msra.mxu1 %v697_v30  ;;  %497 = vmatprep.mubr.bf16.mxu1 %v790_v0 }
  0x44   :  { %467 = vmatprep.subr.bf16.mxu1 %v705_v31 }
  0x45   :  { %427 = vmatpush1.bf16.msra.mxu0 %v700_v32 }
  0x46   :  { %428 = vmatprep.subr.bf16.mxu0 %v708_v33 }
  0x47   :  { %468 = vmatpush1.bf16.msra.mxu1 %v703_v34 }
  0x48   :  { %469 = vmatprep.subr.bf16.mxu1 %v711_v35 }
  0x49   :  { %429 = vmatpush1.bf16.msra.mxu0 %v706_v36 }
  0x4b   :  { %470 = vmatpush1.bf16.msra.mxu1 %v709_v37 }
  0x4c   :  { %648 = vmatmul.mubr.msk.bf16.vlgmr.msra.gmra.mrb[8].mxu0 %vm256_vm0, %v39_v14 }
  0x4e   :  { %649 = vmatmul.mubr.msk.bf16.vlgmr.msra.gmra.mrb[8].mxu1 %vm256_vm0, %v39_v14 }
 0x107   :  { %v294_v38 = vpop.f32.mrb[0].mxu0  ;;  %v335_v42 = vpop.f32.mrb[0].mxu1 }
 0x108   :  { %v296_v39 = vpop.f32.mrb[1].mxu0  ;;  %v337_v44 = vpop.f32.mrb[1].mxu1 }
 0x109   :  { %v506_v40 = vadd.f32 %v296_v39, %v294_v38  ;;  %v298_v41 = vpop.f32.mrb[2].mxu0  ;;  %v339_v46 = vpop.f32.mrb[2].mxu1 }
 0x10a   :  { %v299_v43 = vpop.f32.mrb[3].mxu0  ;;  %v340_v47 = vpop.f32.mrb[3].mxu1 }
 0x10b   :  { %v507_v45 = vadd.f32 %v506_v40, %v335_v42 }
 0x10d   :  { %v508_v48 = vadd.f32 %v507_v45, %v337_v44 }
 0x113   :  { %v376_v49 = vpop.f32.mrb[4].mxu0 }
 0x114   :  { %v509_v50 = vadd.f32 %v508_v48, %v376_v49  ;;  %v378_v51 = vpop.f32.mrb[5].mxu0 }
 0x115   :  { %v380_v52 = vpop.f32.mrb[6].mxu0  ;;  %v417_v53 = vpop.f32.mrb[4].mxu1 }
 0x116   :  { %v510_v54 = vadd.f32 %v509_v50, %v378_v51  ;;  %v381_v55 = vpop.f32.mrb[7].mxu0  ;;  %v419_v56 = vpop.f32.mrb[5].mxu1 }
 0x117   :  { %v421_v57 = vpop.f32.mrb[6].mxu1 }
 0x118   :  { %v511_v58 = vadd.f32 %v510_v54, %v417_v53  ;;  %v422_v59 = vpop.f32.mrb[7].mxu1 }
 0x11a   :  { %v512_v60 = vadd.f32 %v511_v58, %v419_v56 }
 0x11f   :  { %v458_v61 = vpop.f32.mrb[8].mxu0 }
 0x120   :  { %v513_v62 = vadd.f32 %v512_v60, %v458_v61  ;;  %v460_v63 = vpop.f32.mrb[9].mxu0 }
 0x121   :  { %v499_v0 = vpop.f32.mrb[8].mxu1  ;;  %v462_v1 = vpop.f32.mrb[10].mxu0 }
 0x122   :  { %v514_v2 = vadd.f32 %v513_v62, %v460_v63  ;;  %v501_v3 = vpop.f32.mrb[9].mxu1  ;;  %v463_v4 = vpop.f32.mrb[11].mxu0 }
 0x123   :  { %v503_v5 = vpop.f32.mrb[10].mxu1 }
 0x124   :  { %v515_v6 = vadd.f32 %v514_v2, %v499_v0  ;;  %v504_v7 = vpop.f32.mrb[11].mxu1 }
 0x126   :  { %v516_v8 = vadd.f32 %v515_v6, %v501_v3 }
 0x128   :  { %517 = vadd.xlane.f32.xlu0 %v516_v8 }
 0x1b5   :  { %v518_v9 = vpop.xlane.xlu0 %517 }
 0x1b6   :  { %v519_v10 = vmul.f32 0.0006510417, %v518_v9 }
 0x1b8   :  { %v520_v11 = vsub.f32 %v294_v38, %v519_v10  ;;  %v521_v12 = vsub.f32 %v296_v39, %v519_v10  ;;  %v522_v13 = vsub.f32 %v335_v42, %v519_v10  ;;  %v523_v16 = vsub.f32 %v337_v44, %v519_v10 }
 0x1b9   :  { %v524_v17 = vsub.f32 %v376_v49, %v519_v10  ;;  %v525_v20 = vsub.f32 %v378_v51, %v519_v10  ;;  %v526_v23 = vsub.f32 %v417_v53, %v519_v10  ;;  %v527_v26 = vsub.f32 %v419_v56, %v519_v10 }
 0x1ba   :  { %v532_v14 = vmul.f32 %v520_v11, %v520_v11  ;;  %v533_v15 = vmul.f32 %v521_v12, %v521_v12  ;;  %v534_v18 = vmul.f32 %v522_v13, %v522_v13  ;;  %v535_v21 = vmul.f32 %v523_v16, %v523_v16 }
 0x1bb   :  { %v536_v24 = vmul.f32 %v524_v17, %v524_v17  ;;  %v537_v27 = vmul.f32 %v525_v20, %v525_v20  ;;  %v528_v29 = vsub.f32 %v458_v61, %v519_v10  ;;  %v538_v30 = vmul.f32 %v526_v23, %v526_v23 }
 0x1bc   :  { %v544_v19 = vadd.f32 %v533_v15, %v532_v14  ;;  %v529_v32 = vsub.f32 %v460_v63, %v519_v10  ;;  %v539_v33 = vmul.f32 %v527_v26, %v527_v26  ;;  %v530_v35 = vsub.f32 %v499_v0, %v519_v10 }
 0x1bd   :  { %v540_v36 = vmul.f32 %v528_v29, %v528_v29  ;;  %v531_v38 = vsub.f32 %v501_v3, %v519_v10 }
 0x1be   :  { %v545_v22 = vadd.f32 %v544_v19, %v534_v18  ;;  %v541_v39 = vmul.f32 %v529_v32, %v529_v32  ;;  %v542_v41 = vmul.f32 %v530_v35, %v530_v35 }
 0x1bf   :  { %v543_v43 = vmul.f32 %v531_v38, %v531_v38 }
 0x1c0   :  { %v546_v25 = vadd.f32 %v545_v22, %v535_v21 }
 0x1c2   :  { %v547_v28 = vadd.f32 %v546_v25, %v536_v24 }
 0x1c4   :  { %v548_v31 = vadd.f32 %v547_v28, %v537_v27 }
 0x1c6   :  { %v549_v34 = vadd.f32 %v548_v31, %v538_v30 }
 0x1c8   :  { %v550_v37 = vadd.f32 %v549_v34, %v539_v33 }
 0x1ca   :  { %v551_v40 = vadd.f32 %v550_v37, %v540_v36 }
 0x1cc   :  { %v552_v42 = vadd.f32 %v551_v40, %v541_v39 }
 0x1ce   :  { %v553_v44 = vadd.f32 %v552_v42, %v542_v41 }
 0x1d0   :  { %v554_v45 = vadd.f32 %v553_v44, %v543_v43 }
 0x1d2   :  { %555 = vadd.xlane.f32.xlu0 %v554_v45 }
 0x25f   :  { %v556_v46 = vpop.xlane.xlu0 %555 }
 0x260   :  { %v557_v47 = vmul.f32 0.0006510417, %v556_v46 }
 0x262   :  { %v558_v48 = vadd.f32 1e-05, %v557_v47 }
 0x264   :  { %712 = vrsqrt.f32 %v558_v48 }
 0x26e   :  { %v713_v49 = vpop.eup %712 }
 0x26f   :  { %v560_v50 = vmul.f32 0.5, %v713_v49 }
 0x271   :  { %v561_v51 = vmul.f32 %v560_v50, %v520_v11  ;;  %v562_v52 = vmul.f32 %v560_v50, %v521_v12  ;;  %v563_v53 = vmul.f32 %v560_v50, %v522_v13  ;;  %v564_v54 = vmul.f32 %v560_v50, %v523_v16 }
 0x272   :  { %v565_v55 = vmul.f32 %v560_v50, %v524_v17  ;;  %v566_v56 = vmul.f32 %v560_v50, %v525_v20  ;;  %v567_v57 = vmul.f32 %v560_v50, %v526_v23  ;;  %v568_v58 = vmul.f32 %v560_v50, %v527_v26 }
 0x273   :  { %v569_v59 = vmul.f32 %v560_v50, %v528_v29  ;;  %v570_v60 = vmul.f32 %v560_v50, %v529_v32  ;;  %v571_v61 = vmul.f32 %v560_v50, %v530_v35  ;;  %v572_v62 = vmul.f32 %v560_v50, %v531_v38  ;;  %573 = vst [vmem:[#allocation7] sm:$0xff] %v561_v51 }
 0x274   :  { %574 = vst [vmem:[#allocation7 + $0x8] sm:$0xff] %v562_v52  ;;  %576 = vst [vmem:[#allocation7 + $0x10] sm:$0xff] %v563_v53 }
 0x275   :  { %577 = vst [vmem:[#allocation7 + $0x18] sm:$0xff] %v564_v54  ;;  %579 = vst [vmem:[#allocation7 + $0x20] sm:$0xff] %v565_v55 }
 0x276   :  { %580 = vst [vmem:[#allocation7 + $0x28] sm:$0xff] %v566_v56  ;;  %582 = vst [vmem:[#allocation7 + $0x30] sm:$0xff] %v567_v57 }
 0x277   :  { %583 = vst [vmem:[#allocation7 + $0x38] sm:$0xff] %v568_v58  ;;  %585 = vst [vmem:[#allocation7 + $0x40] sm:$0xff] %v569_v59 }
 0x278   :  { %586 = vst [vmem:[#allocation7 + $0x48] sm:$0xff] %v570_v60  ;;  %588 = vst [vmem:[#allocation7 + $0x50] sm:$0xff] %v571_v61 }
 0x279   :  { %589 = vst [vmem:[#allocation7 + $0x58] sm:$0xff] %v572_v62 }
 0x27a   :  { %769 = shalt.err (!%p766_p6)
}
 0x27b   :  { %s770_s10 = scalar_lea.hbm %s866_s2, 1536 }
 0x27c   :  { %p771_p7 = scmp.ne.s32.totalorder %s866_s2, %s770_s10  ;;  %p774_p8 = scmp.lt.u32.totalorder %s770_s10, %s866_s2 }
 0x27e   :  { %p776_p9 = pnand %p774_p8, %p771_p7 }
 0x280   :  { %779 = shalt.err (!%p776_p9)
}
 0x281   :  { %s792_s15 = smov 256   ;;  %s793_s16 = smov 16  }
 0x282   :  { %601 = dma.vmem_to_hbm [thread:$0]  %s845_s6, 1536, %s866_s2, [#allocation4], %s792_s15, %s792_s15, %s793_s16  }
 0x283   :  { %784 = dma.done.wait [#allocation4], 1536  }
 0x284   :  { %785 = vsyncadd [#allocation4], 4294965760 }
 0x285   :  { %605 = vsyncpa [#allocation3], 1 }
 0x286   :  { %606 = vsyncpa [#allocation6], 1 }
 0x287   :  { %607 = vsyncpa [#allocation4], 1 }

</bundles_post_ra>
